<compile_context>
chip_gen: v5e
topology: v5e:2x2
jax: 0.10.0
libtpu: 0.0.40
codegen_flags: <defaults>
</compile_context>

<pallas_src>
import numpy as np
import jax
import jax.numpy as jnp
from jax.experimental import pallas as pl
from jax.experimental.pallas import tpu as pltpu

BN_EPS = 1e-5
VMEM_LIMIT = 32 * 1024 * 1024   # safe on v5e/v6e (128 MiB) and v7x (64 MiB)


def _round_up(x, m):
    return (x + m - 1) // m * m


# ----------------------------------------------------------------------------
# Path A kernels: single im2col matmul (small Cin)
# ----------------------------------------------------------------------------
def _im2col_stats_kernel(xc_ref, w_ref, sum_ref, ssq_ref):
    # xc_ref : (1, M, K_p)    bf16 im2col tile (rows = flattened spatial)
    # w_ref  : (K_p, Cout_p)  bf16, VMEM-resident
    # sum_ref/ssq_ref : (1, 1, Cout_p) f32, resident per image across row tiles
    @pl.when(pl.program_id(1) == 0)
    def _init():
        sum_ref[...] = jnp.zeros_like(sum_ref)
        ssq_ref[...] = jnp.zeros_like(ssq_ref)

    acc = jnp.dot(xc_ref[0], w_ref[...], preferred_element_type=jnp.float32)
    sum_ref[...] += jnp.sum(acc, axis=0, keepdims=True)[None]
    ssq_ref[...] += jnp.sum(acc * acc, axis=0, keepdims=True)[None]


def _im2col_bn_relu_kernel(xc_ref, w_ref, scale_ref, bias_ref, o_ref):
    # Recompute the single im2col matmul (f32 accumulator) and fuse the folded
    # BN + ReLU; store only the real (unpadded) output channels.
    acc = jnp.dot(xc_ref[0], w_ref[...], preferred_element_type=jnp.float32)
    y = jnp.maximum(acc * scale_ref[...] + bias_ref[...], 0.0)
    o_ref[...] = y[:, :o_ref.shape[2]][None]


# ----------------------------------------------------------------------------
# Path B kernels: 9 shifted matmuls over row strips (larger Cin)
# ----------------------------------------------------------------------------
def _conv9_stats_kernel(x_ref, halo_ref, w_ref, y_ref, sum_ref, ssq_ref):
    # x_ref    : (1, T, W+2, Cin_p) bf16 padded row strip for this tile
    # halo_ref : (1, 2, W+2, Cin_p) bf16, the 2 rows just below the strip
    # w_ref    : (9, Cin_p, Cout_p) bf16, VMEM-resident
    # y_ref    : (1, T, W, Cout_p)  bf16 conv output tile
    # sum_ref/ssq_ref : (1, 1, Cout_p) f32 per-image accumulators
    T = x_ref.shape[1]
    W = x_ref.shape[2] - 2
    Cin_p = x_ref.shape[3]
    Cout_p = y_ref.shape[3]

    @pl.when(pl.program_id(1) == 0)
    def _init():
        sum_ref[...] = jnp.zeros_like(sum_ref)
        ssq_ref[...] = jnp.zeros_like(ssq_ref)

    # (T+2, W+2, Cin_p) row strip: this tile's rows plus a 2-row halo.
    rows = jnp.concatenate([x_ref[0], halo_ref[0]], axis=0)

    acc = jnp.zeros((T * W, Cout_p), dtype=jnp.float32)
    for ky in range(3):
        for kx in range(3):
            win = rows[ky:ky + T, kx:kx + W, :].reshape(T * W, Cin_p)
            # TODO(synk): on v7x the 9 taps could accumulate in the MXU result
            # buffer (MRB) via explicit pltpu.matmul_* driving instead of 8
            # full f32 VPU adds over the tile.
            acc = acc + jnp.dot(win, w_ref[ky * 3 + kx],
                                preferred_element_type=jnp.float32)

    y_ref[...] = acc.reshape(1, T, W, Cout_p).astype(y_ref.dtype)
    sum_ref[...] += jnp.sum(acc, axis=0, keepdims=True)[None]
    ssq_ref[...] += jnp.sum(acc * acc, axis=0, keepdims=True)[None]


def _bn_relu_kernel(y_ref, scale_ref, bias_ref, o_ref):
    # y_ref: (1, T2, W, Cout_p) bf16; scale/bias: (1, 1, 1, Cout_p) f32.
    y = y_ref[...].astype(jnp.float32)
    out = jnp.maximum(y * scale_ref[...] + bias_ref[...], 0.0)
    o_ref[...] = out[..., :o_ref.shape[3]]


# ----------------------------------------------------------------------------
# BN statistics folding (done once per channel, outside the kernels)
# ----------------------------------------------------------------------------
def _fold_bn(sum_per_n, ssq_per_n, gamma, beta, count, cout_p):
    s1 = jnp.sum(sum_per_n, axis=0)      # (1, Cout_p)
    s2 = jnp.sum(ssq_per_n, axis=0)
    mean = s1 / count
    # E[x^2]-E[x]^2 can cancel for large-mean channels; clamp keeps it >= 0.
    # TODO(synk): a per-channel shift / Welford-style merge would be safer.
    var = jnp.maximum(s2 / count - mean * mean, 0.0)
    inv_std = jax.lax.rsqrt(var + BN_EPS)
    cout = gamma.shape[0]
    gamma_p = jnp.pad(gamma.astype(jnp.float32), (0, cout_p - cout)).reshape(1, cout_p)
    beta_p = jnp.pad(beta.astype(jnp.float32), (0, cout_p - cout)).reshape(1, cout_p)
    scale = gamma_p * inv_std            # padded channels: gamma = 0 -> 0
    bias = beta_p - mean * scale
    return scale, bias


# ----------------------------------------------------------------------------
# Path A wrapper (9*Cin <= 128)
# ----------------------------------------------------------------------------
def _forward_im2col(x_nchw, weight_oihw, gamma, beta):
    N, Cin, H, W = x_nchw.shape
    Cout = weight_oihw.shape[0]
    HW = H * W
    K = 9 * Cin
    K_p = _round_up(K, 128)
    Cout_p = _round_up(Cout, 128)

    # Large lane-dense row tiles.  At M=4096, K_p=Cout_p=128 the working set
    # is ~8 MiB: well inside v7x's VMEM and lots of headroom on v5e/v6e.
    M = _round_up(HW, 8) if HW <= 4096 else 4096
    HWp = _round_up(HW, M)
    n_rt = HWp // M

    # im2col (bf16): x_col[n, h*W+w, (ky*3+kx)*Cin+ci] = x_pad[n, h+ky, w+kx, ci]
    x_nhwc = jnp.transpose(x_nchw, (0, 2, 3, 1)).astype(jnp.float32)
    x_pad = jnp.pad(x_nhwc, ((0, 0), (1, 1), (1, 1), (0, 0)))
    cols = [x_pad[:, ky:ky + H, kx:kx + W, :] for ky in range(3) for kx in range(3)]
    x_col = jnp.concatenate(cols, axis=-1).reshape(N, HW, K)
    x_col = jnp.pad(x_col, ((0, 0), (0, HWp - HW), (0, K_p - K))).astype(jnp.bfloat16)

    # (Cout, Cin, 3, 3) -> (K_p, Cout_p) bf16 with matching row ordering.
    w2 = jnp.transpose(weight_oihw.astype(jnp.float32), (2, 3, 1, 0)).reshape(K, Cout)
    w2 = jnp.pad(w2, ((0, K_p - K), (0, Cout_p - Cout))).astype(jnp.bfloat16)

    # ---- Pass 1: per-image per-channel sum / sum-of-squares (no y to HBM) ---
    s1, s2 = pl.pallas_call(
        _im2col_stats_kernel,
        out_shape=(jax.ShapeDtypeStruct((N, 1, Cout_p), jnp.float32),
                   jax.ShapeDtypeStruct((N, 1, Cout_p), jnp.float32)),
        grid=(N, n_rt),
        in_specs=[
            pl.BlockSpec((1, M, K_p), lambda n, r: (n, r, 0)),
            pl.BlockSpec((K_p, Cout_p), lambda n, r: (0, 0)),
        ],
        out_specs=(pl.BlockSpec((1, 1, Cout_p), lambda n, r: (n, 0, 0)),
                   pl.BlockSpec((1, 1, Cout_p), lambda n, r: (n, 0, 0))),
        compiler_params=pltpu.CompilerParams(
            dimension_semantics=("parallel", "arbitrary"),
            vmem_limit_bytes=VMEM_LIMIT),
    )(x_col, w2)

    # Zero-padded rows/columns contribute 0 to the sums, so divide by the true
    # element count.
    scale, bias = _fold_bn(s1, s2, gamma, beta, jnp.float32(N * HW), Cout_p)

    # ---- Pass 2: recompute matmul fused with BN + ReLU, unpadded channels ---
    out = pl.pallas_call(
        _im2col_bn_relu_kernel,
        out_shape=jax.ShapeDtypeStruct((N, HWp, Cout), jnp.float32),
        grid=(N, n_rt),
        in_specs=[
            pl.BlockSpec((1, M, K_p), lambda n, r: (n, r, 0)),
            pl.BlockSpec((K_p, Cout_p), lambda n, r: (0, 0)),
            pl.BlockSpec((1, Cout_p), lambda n, r: (0, 0)),
            pl.BlockSpec((1, Cout_p), lambda n, r: (0, 0)),
        ],
        out_specs=pl.BlockSpec((1, M, Cout), lambda n, r: (n, r, 0)),
        compiler_params=pltpu.CompilerParams(
            dimension_semantics=("parallel", "parallel"),
            vmem_limit_bytes=VMEM_LIMIT),
    )(x_col, w2, scale, bias)

    # W is not a multiple of 128, so an in-kernel NCHW store would be a masked
    # partial-lane write; keep the layout change in XLA (output is unpadded).
    out = out[:, :HW, :].reshape(N, H, W, Cout)
    return jnp.transpose(out, (0, 3, 1, 2))


# ----------------------------------------------------------------------------
# Path B wrapper (larger Cin): 9-tap row-strip kernel
# ----------------------------------------------------------------------------
def _pick_tile_h(H, W, cin_p, cout_p, budget_bytes=12 * 1024 * 1024):
    """Largest divisor of H (<= 64) whose pass-1 VMEM working set fits,
    including the in-kernel temporaries (rows copy, f32 accumulator, window)."""
    def vmem_est(t):
        return (2 * 2 * t * (W + 2) * cin_p        # main strip, x2 buffers, bf16
                + 2 * 2 * 2 * (W + 2) * cin_p      # 2-row halo, x2 buffers, bf16
                + 2 * 2 * t * W * cout_p           # y tile, x2 buffers, bf16
                + 2 * 9 * cin_p * cout_p           # resident weight, bf16
                + 2 * (t + 2) * (W + 2) * cin_p    # concatenated rows copy
                + 4 * t * W * cout_p               # f32 accumulator
                + 2 * t * W * cin_p)               # one materialised window
    cands = [t for t in range(1, H + 1) if H % t == 0]
    fits = [t for t in cands if t <= 64 and vmem_est(t) <= budget_bytes]
    return max(fits) if fits else min(cands)


def _forward_conv9(x_nchw, weight_oihw, gamma, beta):
    N, Cin, H, W = x_nchw.shape
    Cout = weight_oihw.shape[0]
    Cin_p = _round_up(Cin, 128)
    Cout_p = _round_up(Cout, 128)
    T = _pick_tile_h(H, W, Cin_p, Cout_p)
    n_rt = H // T
    Wp = W + 2

    # NCHW -> NHWC bf16; zero-pad 1 row/col each side + channels to 128 lanes.
    x = jnp.transpose(x_nchw, (0, 2, 3, 1)).astype(jnp.float32)
    x = jnp.pad(x, ((0, 0), (1, 1), (1, 1), (0, Cin_p - Cin))).astype(jnp.bfloat16)
    # 2-row halo below each row tile: padded rows [r*T + T, r*T + T + 2).
    row_idx = jnp.arange(n_rt)[:, None] * T + T + jnp.arange(2)[None, :]
    halo = x[:, row_idx].reshape(N * n_rt, 2, Wp, Cin_p)

    # (Cout, Cin, 3, 3) -> (9, Cin_p, Cout_p) bf16.
    w = jnp.transpose(weight_oihw.astype(jnp.float32), (2, 3, 1, 0))
    w = jnp.pad(w, ((0, 0), (0, 0), (0, Cin_p - Cin), (0, Cout_p - Cout)))
    w = w.reshape(9, Cin_p, Cout_p).astype(jnp.bfloat16)

    # ---- Pass 1: conv (bf16 y) + per-image sum / sum-of-squares -------------
    y, s1, s2 = pl.pallas_call(
        _conv9_stats_kernel,
        out_shape=(jax.ShapeDtypeStruct((N, H, W, Cout_p), jnp.bfloat16),
                   jax.ShapeDtypeStruct((N, 1, Cout_p), jnp.float32),
                   jax.ShapeDtypeStruct((N, 1, Cout_p), jnp.float32)),
        grid=(N, n_rt),
        in_specs=[
            pl.BlockSpec((1, T, Wp, Cin_p), lambda n, r: (n, r, 0, 0)),
            pl.BlockSpec((1, 2, Wp, Cin_p), lambda n, r: (n * n_rt + r, 0, 0, 0)),
            pl.BlockSpec((9, Cin_p, Cout_p), lambda n, r: (0, 0, 0)),
        ],
        out_specs=(
            pl.BlockSpec((1, T, W, Cout_p), lambda n, r: (n, r, 0, 0)),
            pl.BlockSpec((1, 1, Cout_p), lambda n, r: (n, 0, 0)),
            pl.BlockSpec((1, 1, Cout_p), lambda n, r: (n, 0, 0)),
        ),
        compiler_params=pltpu.CompilerParams(
            dimension_semantics=("parallel", "arbitrary"),
            vmem_limit_bytes=VMEM_LIMIT),
    )(x, halo, w)

    scale, bias = _fold_bn(s1, s2, gamma, beta, jnp.float32(N * H * W), Cout_p)
    scale4 = scale.reshape(1, 1, 1, Cout_p)
    bias4 = bias.reshape(1, 1, 1, Cout_p)

    # ---- Pass 2: BN + ReLU, re-tiled with whole-image blocks when they fit --
    def _fits(t):
        return (2 * 2 * t * W * Cout_p + 2 * 4 * t * W * Cout
                + 4 * t * W * Cout_p) <= 16 * 1024 * 1024
    T2 = H if _fits(H) else T

    out = pl.pallas_call(
        _bn_relu_kernel,
        out_shape=jax.ShapeDtypeStruct((N, H, W, Cout), jnp.float32),
        grid=(N, H // T2),
        in_specs=[
            pl.BlockSpec((1, T2, W, Cout_p), lambda n, r: (n, r, 0, 0)),
            pl.BlockSpec((1, 1, 1, Cout_p), lambda n, r: (0, 0, 0, 0)),
            pl.BlockSpec((1, 1, 1, Cout_p), lambda n, r: (0, 0, 0, 0)),
        ],
        out_specs=pl.BlockSpec((1, T2, W, Cout), lambda n, r: (n, r, 0, 0)),
        compiler_params=pltpu.CompilerParams(
            dimension_semantics=("parallel", "parallel"),
            vmem_limit_bytes=VMEM_LIMIT),
    )(y, scale4, bias4)

    return jnp.transpose(out, (0, 3, 1, 2))


# ----------------------------------------------------------------------------
# Top level
# ----------------------------------------------------------------------------
@jax.jit
def conv_block_single_pallas(x_nchw, weight_oihw, gamma, beta):
    """Conv2d(3x3, s=1, p=1, bias=False) + BatchNorm2d (batch stats) + ReLU.
    x: (N, Cin, H, W) f32 -> (N, Cout, H, W) f32."""
    Cin = x_nchw.shape[1]
    if 9 * Cin <= 128:          # im2col costs no extra HBM bytes at small Cin
        return _forward_im2col(x_nchw, weight_oihw, gamma, beta)
    return _forward_conv9(x_nchw, weight_oihw, gamma, beta)


def _reference(x_nchw, weight_oihw, gamma, beta):
    """Plain-JAX f32 reference matching PyTorch semantics (training-mode BN)."""
    y = jax.lax.conv_general_dilated(
        x_nchw.astype(jnp.float32), weight_oihw.astype(jnp.float32),
        window_strides=(1, 1), padding=((1, 1), (1, 1)),
        dimension_numbers=("NCHW", "OIHW", "NCHW"))
    mean = jnp.mean(y, axis=(0, 2, 3), keepdims=True)
    var = jnp.mean((y - mean) ** 2, axis=(0, 2, 3), keepdims=True)
    y = (y - mean) * jax.lax.rsqrt(var + BN_EPS)
    y = y * gamma.reshape(1, -1, 1, 1) + beta.reshape(1, -1, 1, 1)
    return jnp.maximum(y, 0.0)


if __name__ == "__main__":
    key = jax.random.PRNGKey(0)

    configs = [
        # (N, Cin, H, W, Cout, random_affine)
        (2, 4, 16, 16, 8, False),    # module example size -> im2col path
        (2, 3, 24, 16, 5, True),     # odd channel counts   -> im2col path
        (2, 64, 16, 16, 32, True),   # larger Cin           -> 9-tap strip path
    ]
    for idx, (N, Cin, H, W, Cout, rand_affine) in enumerate(configs):
        kx, kw, kg, kb, key = jax.random.split(jax.random.fold_in(key, idx), 5)
        x = jax.random.normal(kx, (N, Cin, H, W), dtype=jnp.float32)
        bound = 1.0 / np.sqrt(Cin * 9)
        weight = jax.random.uniform(kw, (Cout, Cin, 3, 3), dtype=jnp.float32,
                                    minval=-bound, maxval=bound)
        if rand_affine:
            gamma = 1.0 + 0.1 * jax.random.normal(kg, (Cout,), dtype=jnp.float32)
            beta = 0.1 * jax.random.normal(kb, (Cout,), dtype=jnp.float32)
        else:
            gamma = jnp.ones((Cout,), dtype=jnp.float32)   # BatchNorm2d defaults
            beta = jnp.zeros((Cout,), dtype=jnp.float32)

        out = jax.block_until_ready(conv_block_single_pallas(x, weight, gamma, beta))
        ref = jax.block_until_ready(_reference(x, weight, gamma, beta))
        # bf16 MXU operands (with f32 accumulation) add ~2^-8 relative error to
        # the conv, hence the looser-than-f32 tolerance.
        np.testing.assert_allclose(np.asarray(out), np.asarray(ref),
                                   rtol=2e-2, atol=2e-2)

    print("KERNEL_OK")
</pallas_src>

<mosaic_0001>
module attributes {stable_mosaic.version = 11 : i64} {
  func.func @_im2col_stats_kernel(%arg0: i32, %arg1: i32, %arg2: memref<1x256x128xbf16, #tpu.memory_space<vmem>>, %arg3: memref<128x128xbf16, #tpu.memory_space<vmem>>, %arg4: memref<1x1x128xf32, #tpu.memory_space<vmem>>, %arg5: memref<1x1x128xf32, #tpu.memory_space<vmem>>) attributes {dimension_semantics = [#tpu.dimension_semantics<parallel>, #tpu.dimension_semantics<arbitrary>], iteration_bounds = array<i64: 2, 1>, scalar_prefetch = 0 : i64, scratch_operands = 0 : i64, tpu.core_type = #tpu.core_type<tc>, window_params = [{transform_indices = @transform_0, window_bounds = array<i64: 1, 256, 128>}, {pipeline_mode = #tpu.pipeline_mode<synchronous>, transform_indices = @transform_1, window_bounds = array<i64: 128, 128>}, {transform_indices = @transform_2, window_bounds = array<i64: 1, 1, 128>}, {transform_indices = @transform_3, window_bounds = array<i64: 1, 1, 128>}]} {
    %c0_i32 = arith.constant 0 : i32
    %0 = arith.cmpi eq, %arg1, %c0_i32 : i32
    %1 = arith.extui %0 : i1 to i32
    %c0_i32_0 = arith.constant 0 : i32
    %2 = arith.cmpi ne, %1, %c0_i32_0 : i32
    scf.if %2 {
      %cst_19 = arith.constant 0.000000e+00 : f32
      %20 = vector.broadcast %cst_19 : f32 to vector<1x1x128xf32>
      %c0_20 = arith.constant 0 : index
      %c0_21 = arith.constant 0 : index
      %c0_22 = arith.constant 0 : index
      %21 = vector.load %arg4[%c0_20, %c0_21, %c0_22] : memref<1x1x128xf32, #tpu.memory_space<vmem>>, vector<1x1x128xf32>
      tpu.vector_store %arg4[%c0_20, %c0_21, %c0_22], %20 {strides = array<i32>} : memref<1x1x128xf32, #tpu.memory_space<vmem>>, vector<1x1x128xf32>,
      %cst_23 = arith.constant 0.000000e+00 : f32
      %22 = vector.broadcast %cst_23 : f32 to vector<1x1x128xf32>
      %c0_24 = arith.constant 0 : index
      %c0_25 = arith.constant 0 : index
      %c0_26 = arith.constant 0 : index
      %23 = vector.load %arg5[%c0_24, %c0_25, %c0_26] : memref<1x1x128xf32, #tpu.memory_space<vmem>>, vector<1x1x128xf32>
      tpu.vector_store %arg5[%c0_24, %c0_25, %c0_26], %22 {strides = array<i32>} : memref<1x1x128xf32, #tpu.memory_space<vmem>>, vector<1x1x128xf32>,
    } else {
    }
    %c0 = arith.constant 0 : index
    %c0_1 = arith.constant 0 : index
    %c0_2 = arith.constant 0 : index
    %3 = vector.load %arg2[%c0, %c0_1, %c0_2] : memref<1x256x128xbf16, #tpu.memory_space<vmem>>, vector<1x256x128xbf16>
    %4 = vector.shape_cast %3 : vector<1x256x128xbf16> to vector<256x128xbf16>
    %c0_3 = arith.constant 0 : index
    %c0_4 = arith.constant 0 : index
    %5 = vector.load %arg3[%c0_3, %c0_4] : memref<128x128xbf16, #tpu.memory_space<vmem>>, vector<128x128xbf16>
    %cst = arith.constant dense<0.000000e+00> : vector<256x128xf32>
    %6 = tpu.matmul %4, %5, %cst {dimension_numbers = #tpu.dot_dimension_numbers<[1], [0], [0], [1], [0, 0, 1, 1], [], []>} : vector<256x128xbf16>, vector<128x128xbf16>, vector<256x128xf32> -> vector<256x128xf32>
    %c0_5 = arith.constant 0 : index
    %c0_6 = arith.constant 0 : index
    %c0_7 = arith.constant 0 : index
    %7 = vector.load %arg4[%c0_5, %c0_6, %c0_7] : memref<1x1x128xf32, #tpu.memory_space<vmem>>, vector<1x1x128xf32>
    %cst_8 = arith.constant dense<0.000000e+00> : vector<128xf32>
    %8 = vector.multi_reduction <add>, %6, %cst_8 [0] : vector<256x128xf32> to vector<128xf32>
    %9 = vector.shape_cast %8 : vector<128xf32> to vector<1x128xf32>
    %10 = vector.shape_cast %9 : vector<1x128xf32> to vector<1x1x128xf32>
    %11 = arith.addf %7, %10 : vector<1x1x128xf32>
    %c0_9 = arith.constant 0 : index
    %c0_10 = arith.constant 0 : index
    %c0_11 = arith.constant 0 : index
    %12 = vector.load %arg4[%c0_9, %c0_10, %c0_11] : memref<1x1x128xf32, #tpu.memory_space<vmem>>, vector<1x1x128xf32>
    tpu.vector_store %arg4[%c0_9, %c0_10, %c0_11], %11 {strides = array<i32>} : memref<1x1x128xf32, #tpu.memory_space<vmem>>, vector<1x1x128xf32>,
    %c0_12 = arith.constant 0 : index
    %c0_13 = arith.constant 0 : index
    %c0_14 = arith.constant 0 : index
    %13 = vector.load %arg5[%c0_12, %c0_13, %c0_14] : memref<1x1x128xf32, #tpu.memory_space<vmem>>, vector<1x1x128xf32>
    %14 = arith.mulf %6, %6 : vector<256x128xf32>
    %cst_15 = arith.constant dense<0.000000e+00> : vector<128xf32>
    %15 = vector.multi_reduction <add>, %14, %cst_15 [0] : vector<256x128xf32> to vector<128xf32>
    %16 = vector.shape_cast %15 : vector<128xf32> to vector<1x128xf32>
    %17 = vector.shape_cast %16 : vector<1x128xf32> to vector<1x1x128xf32>
    %18 = arith.addf %13, %17 : vector<1x1x128xf32>
    %c0_16 = arith.constant 0 : index
    %c0_17 = arith.constant 0 : index
    %c0_18 = arith.constant 0 : index
    %19 = vector.load %arg5[%c0_16, %c0_17, %c0_18] : memref<1x1x128xf32, #tpu.memory_space<vmem>>, vector<1x1x128xf32>
    tpu.vector_store %arg5[%c0_16, %c0_17, %c0_18], %18 {strides = array<i32>} : memref<1x1x128xf32, #tpu.memory_space<vmem>>, vector<1x1x128xf32>,
    return
  }
  func.func @transform_0(%arg0: i32, %arg1: i32) -> (i32, i32, i32) {
    %c0_i32 = arith.constant 0 : i32
    %c0_i32_0 = arith.constant 0 : i32
    return %arg0, %arg1, %c0_i32 : i32, i32, i32
  }
  func.func @transform_1(%arg0: i32, %arg1: i32) -> (i32, i32) {
    %c0_i32 = arith.constant 0 : i32
    %c0_i32_0 = arith.constant 0 : i32
    %c0_i32_1 = arith.constant 0 : i32
    return %c0_i32, %c0_i32_0 : i32, i32
  }
  func.func @transform_2(%arg0: i32, %arg1: i32) -> (i32, i32, i32) {
    %c0_i32 = arith.constant 0 : i32
    %c0_i32_0 = arith.constant 0 : i32
    %c0_i32_1 = arith.constant 0 : i32
    return %arg0, %c0_i32, %c0_i32_0 : i32, i32, i32
  }
  func.func @transform_3(%arg0: i32, %arg1: i32) -> (i32, i32, i32) {
    %c0_i32 = arith.constant 0 : i32
    %c0_i32_0 = arith.constant 0 : i32
    %c0_i32_1 = arith.constant 0 : i32
    return %arg0, %c0_i32, %c0_i32_0 : i32, i32, i32
  }
}

module attributes {stable_mosaic.version = 11 : i64} {
  func.func @_im2col_bn_relu_kernel(%arg0: i32, %arg1: i32, %arg2: memref<1x256x128xbf16, #tpu.memory_space<vmem>>, %arg3: memref<128x128xbf16, #tpu.memory_space<vmem>>, %arg4: memref<1x128xf32, #tpu.memory_space<vmem>>, %arg5: memref<1x128xf32, #tpu.memory_space<vmem>>, %arg6: memref<1x256x8xf32, #tpu.memory_space<vmem>>) attributes {dimension_semantics = [#tpu.dimension_semantics<parallel>, #tpu.dimension_semantics<parallel>], iteration_bounds = array<i64: 2, 1>, scalar_prefetch = 0 : i64, scratch_operands = 0 : i64, tpu.core_type = #tpu.core_type<tc>, window_params = [{transform_indices = @transform_0, window_bounds = array<i64: 1, 256, 128>}, {pipeline_mode = #tpu.pipeline_mode<synchronous>, transform_indices = @transform_1, window_bounds = array<i64: 128, 128>}, {pipeline_mode = #tpu.pipeline_mode<synchronous>, transform_indices = @transform_2, window_bounds = array<i64: 1, 128>}, {pipeline_mode = #tpu.pipeline_mode<synchronous>, transform_indices = @transform_3, window_bounds = array<i64: 1, 128>}, {transform_indices = @transform_4, window_bounds = array<i64: 1, 256, 8>}]} {
    %c0 = arith.constant 0 : index
    %c0_0 = arith.constant 0 : index
    %c0_1 = arith.constant 0 : index
    %0 = vector.load %arg2[%c0, %c0_0, %c0_1] : memref<1x256x128xbf16, #tpu.memory_space<vmem>>, vector<1x256x128xbf16>
    %1 = vector.shape_cast %0 : vector<1x256x128xbf16> to vector<256x128xbf16>
    %c0_2 = arith.constant 0 : index
    %c0_3 = arith.constant 0 : index
    %2 = vector.load %arg3[%c0_2, %c0_3] : memref<128x128xbf16, #tpu.memory_space<vmem>>, vector<128x128xbf16>
    %cst = arith.constant dense<0.000000e+00> : vector<256x128xf32>
    %3 = tpu.matmul %1, %2, %cst {dimension_numbers = #tpu.dot_dimension_numbers<[1], [0], [0], [1], [0, 0, 1, 1], [], []>} : vector<256x128xbf16>, vector<128x128xbf16>, vector<256x128xf32> -> vector<256x128xf32>
    %c0_4 = arith.constant 0 : index
    %c0_5 = arith.constant 0 : index
    %4 = vector.load %arg4[%c0_4, %c0_5] : memref<1x128xf32, #tpu.memory_space<vmem>>, vector<1x128xf32>
    %5 = vector.broadcast %4 : vector<1x128xf32> to vector<256x128xf32>
    %6 = arith.mulf %3, %5 : vector<256x128xf32>
    %c0_6 = arith.constant 0 : index
    %c0_7 = arith.constant 0 : index
    %7 = vector.load %arg5[%c0_6, %c0_7] : memref<1x128xf32, #tpu.memory_space<vmem>>, vector<1x128xf32>
    %8 = vector.broadcast %7 : vector<1x128xf32> to vector<256x128xf32>
    %9 = arith.addf %6, %8 : vector<256x128xf32>
    %cst_8 = arith.constant 0.000000e+00 : f32
    %10 = vector.broadcast %cst_8 : f32 to vector<256x128xf32>
    %11 = arith.maximumf %9, %10 : vector<256x128xf32>
    %12 = vector.extract_strided_slice %11 {offsets = [0, 0], sizes = [256, 8], strides = [1, 1]} : vector<256x128xf32> to vector<256x8xf32>
    %13 = vector.shape_cast %12 : vector<256x8xf32> to vector<1x256x8xf32>
    %c0_9 = arith.constant 0 : index
    %c0_10 = arith.constant 0 : index
    %c0_11 = arith.constant 0 : index
    %14 = vector.load %arg6[%c0_9, %c0_10, %c0_11] : memref<1x256x8xf32, #tpu.memory_space<vmem>>, vector<1x256x8xf32>
    tpu.vector_store %arg6[%c0_9, %c0_10, %c0_11], %13 {strides = array<i32>} : memref<1x256x8xf32, #tpu.memory_space<vmem>>, vector<1x256x8xf32>,
    return
  }
  func.func @transform_0(%arg0: i32, %arg1: i32) -> (i32, i32, i32) {
    %c0_i32 = arith.constant 0 : i32
    %c0_i32_0 = arith.constant 0 : i32
    return %arg0, %arg1, %c0_i32 : i32, i32, i32
  }
  func.func @transform_1(%arg0: i32, %arg1: i32) -> (i32, i32) {
    %c0_i32 = arith.constant 0 : i32
    %c0_i32_0 = arith.constant 0 : i32
    %c0_i32_1 = arith.constant 0 : i32
    return %c0_i32, %c0_i32_0 : i32, i32
  }
  func.func @transform_2(%arg0: i32, %arg1: i32) -> (i32, i32) {
    %c0_i32 = arith.constant 0 : i32
    %c0_i32_0 = arith.constant 0 : i32
    %c0_i32_1 = arith.constant 0 : i32
    return %c0_i32, %c0_i32_0 : i32, i32
  }
  func.func @transform_3(%arg0: i32, %arg1: i32) -> (i32, i32) {
    %c0_i32 = arith.constant 0 : i32
    %c0_i32_0 = arith.constant 0 : i32
    %c0_i32_1 = arith.constant 0 : i32
    return %c0_i32, %c0_i32_0 : i32, i32
  }
  func.func @transform_4(%arg0: i32, %arg1: i32) -> (i32, i32, i32) {
    %c0_i32 = arith.constant 0 : i32
    %c0_i32_0 = arith.constant 0 : i32
    return %arg0, %arg1, %c0_i32 : i32, i32, i32
  }
}

</mosaic_0001>

<bundles_post_ra>
// kernel: conv_block_single_pallas.2
= control target key start
LH: loop header
LB: loop body
LE: loop exit
PB: predicated region body
PF: predicated region fallthrough
CT: control target
= control target key end

     0   :  { %s913_s12 = smov 0   ;;  %s915_s13 = smov 0   ;;  %s1050_s0 = inlined_call_operand.vmem [shape: bf16[2,256,128], index: 0, kind: input, shape index: {}]   ;;  %s1051_s1 = inlined_call_operand.vmem [shape: bf16[128,128], index: 1, kind: input, shape index: {}]   ;;  %s1052_s2 = inlined_call_operand.vmem [shape: f32[2,1,128], index: 2, kind: output, shape index: {0}]   ;;  %s1053_s3 = inlined_call_operand.vmem [shape: f32[2,1,128], index: 3, kind: output, shape index: {1}]  }
   0x1   :  { %s917_s14 = smov 0  }
   0x2 LB: > { %s26_s15 = sadd.s32 1, %s886_s13  ;;  %p693_p0 = scmp.ge.s32.totalorder %s890_s14, 1  ;;  %s890_s14 = sphi %s917_s14, %s14_s14   ;;  %s886_s13 = sphi %s915_s13, %s1055_s13   ;;  %s882_s12 = sphi %s913_s12, %s1054_s12  }
   0x3   : > { %p28_p1 = scmp.ge.s32.totalorder %s26_s15, 2  ;;  %p159_p2 = scmp.lt.s32.totalorder %s890_s14, 3 }
   0x5   : > { %s1057_s15 = smov (%p28_p1, %s26_s15), 0  ;;  %p160_p3 = pnand %p693_p0, %p159_p2 }
   0x6   : > { %p189_p4 = scmp.lt.s32.totalorder (!%p160_p3), %s882_s12, 1 }
   0x7   : > { %163 = sbr.rel (%p160_p3) target bundleno = 293 (0x125), region = 28 }
   0xc   : > { %v818_v0 = vld [vmem:[%s1051_s1 + $0x38] sm:$0xff]  ;;  %v817_v1 = vld [vmem:[%s1051_s1 + $0x30] sm:$0xff]  ;;  %v816_v2 = vld [vmem:[%s1051_s1 + $0x28] sm:$0xff]  ;;  %s1059_s12 = smov (!%p189_p4, %s882_s12), 1 }
   0xd   : > { %402 = vmatpush.bf16.msra.mxu0 %v818_v0  ;;  %819 = vmatpush.bf16.msra.mxu1 %v818_v0  ;;  %v815_v3 = vld [vmem:[%s1051_s1 + $0x20] sm:$0xff]  ;;  %v814_v4 = vld [vmem:[%s1051_s1 + $0x18] sm:$0xff]  ;;  %v813_v5 = vld [vmem:[%s1051_s1 + $0x10] sm:$0xff]  ;;  %s794_s30 = sshll.u32 %s1059_s12, 7  ;;  %s1003_s11 = scalar_lea.vmem %s1052_s2, %s1059_s12 }
   0xe   : > { %820 = vmatpush.bf16.msra.mxu2 %v818_v0  ;;  %821 = vmatpush.bf16.msra.mxu3 %v818_v0  ;;  %v812_v6 = vld [vmem:[%s1051_s1 + $0x8] sm:$0xff]  ;;  %v811_v7 = vld [vmem:[%s1051_s1] sm:$0xff]  ;;  %s965_s8 = scalar_lea.vmem %s1050_s0, %s794_s30  ;;  %s1009_s18 = scalar_lea.vmem %s1053_s3, %s1059_s12 }
   0xf   : > { %v795_v8 = vld [vmem:[%s965_s8] sm:$0xff]  ;;  %v796_v12 = vld [vmem:[%s965_s8 + $0x8] sm:$0xff]  ;;  %v797_v16 = vld [vmem:[%s965_s8 + $0x10] sm:$0xff] }
  0x10   : > { %v799_v9 = vld [vmem:[%s965_s8 + $0x20] sm:$0xff]  ;;  %v800_v13 = vld [vmem:[%s965_s8 + $0x28] sm:$0xff]  ;;  %v801_v17 = vld [vmem:[%s965_s8 + $0x30] sm:$0xff] }
  0x11   : > { %403 = vmatpush.bf16.msra.mxu0 %v817_v1  ;;  %822 = vmatpush.bf16.msra.mxu1 %v817_v1  ;;  %v803_v10 = vld [vmem:[%s965_s8 + $0x40] sm:$0xff]  ;;  %v804_v14 = vld [vmem:[%s965_s8 + $0x48] sm:$0xff]  ;;  %v805_v18 = vld [vmem:[%s965_s8 + $0x50] sm:$0xff] }
  0x12   : > { %823 = vmatpush.bf16.msra.mxu2 %v817_v1  ;;  %824 = vmatpush.bf16.msra.mxu3 %v817_v1  ;;  %v807_v11 = vld [vmem:[%s965_s8 + $0x60] sm:$0xff]  ;;  %v808_v15 = vld [vmem:[%s965_s8 + $0x68] sm:$0xff]  ;;  %v809_v19 = vld [vmem:[%s965_s8 + $0x70] sm:$0xff] }
  0x13   : > { %v798_v20 = vld [vmem:[%s965_s8 + $0x18] sm:$0xff] }
  0x14   : > { %v802_v21 = vld [vmem:[%s965_s8 + $0x38] sm:$0xff] }
  0x15   : > { %404 = vmatpush.bf16.msra.mxu0 %v816_v2  ;;  %825 = vmatpush.bf16.msra.mxu1 %v816_v2  ;;  %v806_v22 = vld [vmem:[%s965_s8 + $0x58] sm:$0xff] }
  0x16   : > { %826 = vmatpush.bf16.msra.mxu2 %v816_v2  ;;  %827 = vmatpush.bf16.msra.mxu3 %v816_v2  ;;  %v810_v23 = vld [vmem:[%s965_s8 + $0x78] sm:$0xff] }
  0x19   : > { %405 = vmatpush.bf16.msra.mxu0 %v815_v3  ;;  %828 = vmatpush.bf16.msra.mxu1 %v815_v3 }
  0x1a   : > { %829 = vmatpush.bf16.msra.mxu2 %v815_v3  ;;  %830 = vmatpush.bf16.msra.mxu3 %v815_v3 }
  0x1d   : > { %406 = vmatpush.bf16.msra.mxu0 %v814_v4  ;;  %831 = vmatpush.bf16.msra.mxu1 %v814_v4 }
  0x1e   : > { %832 = vmatpush.bf16.msra.mxu2 %v814_v4  ;;  %833 = vmatpush.bf16.msra.mxu3 %v814_v4 }
  0x21   : > { %407 = vmatpush.bf16.msra.mxu0 %v813_v5  ;;  %834 = vmatpush.bf16.msra.mxu1 %v813_v5 }
  0x22   : > { %835 = vmatpush.bf16.msra.mxu2 %v813_v5  ;;  %836 = vmatpush.bf16.msra.mxu3 %v813_v5 }
  0x25   : > { %408 = vmatpush.bf16.msra.mxu0 %v812_v6  ;;  %837 = vmatpush.bf16.msra.mxu1 %v812_v6 }
  0x26   : > { %838 = vmatpush.bf16.msra.mxu2 %v812_v6  ;;  %839 = vmatpush.bf16.msra.mxu3 %v812_v6 }
  0x29   : > { %409 = vmatpush.bf16.msra.mxu0 %v811_v7  ;;  %840 = vmatpush.bf16.msra.mxu1 %v811_v7 }
  0x2a   : > { %841 = vmatpush.bf16.msra.mxu2 %v811_v7  ;;  %842 = vmatpush.bf16.msra.mxu3 %v811_v7 }
  0x2c   : > { %410 = vmatmul.bf16.vlgmr.msra.gmra.mxu0 %v795_v8  ;;  %430 = vmatmul.bf16.vlgmr.msra.gmra.mxu1 %v799_v9 }
  0x2d   : > { %450 = vmatmul.bf16.vlgmr.msra.gmra.mxu2 %v803_v10  ;;  %470 = vmatmul.bf16.vlgmr.msra.gmra.mxu3 %v807_v11 }
  0x3c   : > { %415 = vmatmul.bf16.gmra.mxu0 %v796_v12  ;;  %435 = vmatmul.bf16.gmra.mxu1 %v800_v13 }
  0x3d   : > { %455 = vmatmul.bf16.gmra.mxu2 %v804_v14  ;;  %475 = vmatmul.bf16.gmra.mxu3 %v808_v15 }
  0x4c   : > { %420 = vmatmul.bf16.gmra.mxu0 %v797_v16  ;;  %440 = vmatmul.bf16.gmra.mxu1 %v801_v17 }
  0x4d   : > { %460 = vmatmul.bf16.gmra.mxu2 %v805_v18  ;;  %480 = vmatmul.bf16.gmra.mxu3 %v809_v19 }
  0x5c   : > { %425 = vmatmul.bf16.gmra.mxu0 %v798_v20  ;;  %445 = vmatmul.bf16.gmra.mxu1 %v802_v21 }
  0x5d   : > { %465 = vmatmul.bf16.gmra.mxu2 %v806_v22  ;;  %485 = vmatmul.bf16.gmra.mxu3 %v810_v23 }
  0xa9   : > { %v411_v24 = vpop.f32.mrf.mxu0  ;;  %v431_v25 = vpop.f32.mrf.mxu1 }
  0xaa   : > { %v532_v41 = vmul.f32 %v411_v24, %v411_v24  ;;  %v540_v3 = vmul.f32 %v431_v25, %v431_v25 }
  0xb0   : > { %v983_v29 = vpop.f32.mrf.mxu2  ;;  %v987_v35 = vpop.f32.mrf.mxu3 }
  0xb1   : > { %v413_v26 = vpop.f32.mrf.mxu0  ;;  %v433_v27 = vpop.f32.mrf.mxu1 }
  0xb2   : > { %v533_v40 = vmul.f32 %v413_v26, %v413_v26  ;;  %v492_v42 = vadd.f32 %v413_v26, %v411_v24  ;;  %v541_v7 = vmul.f32 %v433_v27, %v433_v27 }
  0xb4   : > { %v564_v45 = vadd.f32 %v533_v40, %v532_v41 }
  0xb8   : > { %v985_v32 = vpop.f32.mrf.mxu2  ;;  %v991_v39 = vpop.f32.mrf.mxu3 }
  0xb9   : > { %v416_v28 = vpop.f32.mrf.mxu0  ;;  %v436_v30 = vpop.f32.mrf.mxu1 }
  0xba   : > { %v534_v43 = vmul.f32 %v416_v28, %v416_v28  ;;  %v493_v46 = vadd.f32 %v492_v42, %v416_v28  ;;  %v542_v11 = vmul.f32 %v436_v30, %v436_v30  ;;  %v549_v42 = vmul.f32 %v985_v32, %v985_v32 }
  0xbc   : > { %v565_v49 = vadd.f32 %v564_v45, %v534_v43 }
  0xc0   : > { %v989_v36 = vpop.f32.mrf.mxu2  ;;  %v995_v56 = vpop.f32.mrf.mxu3 }
  0xc1   : > { %v418_v31 = vpop.f32.mrf.mxu0  ;;  %v438_v33 = vpop.f32.mrf.mxu1 }
  0xc2   : > { %v535_v47 = vmul.f32 %v418_v31, %v418_v31  ;;  %v494_v50 = vadd.f32 %v493_v46, %v418_v31  ;;  %v543_v14 = vmul.f32 %v438_v33, %v438_v33  ;;  %v550_v46 = vmul.f32 %v989_v36, %v989_v36 }
  0xc4   : > { %v566_v53 = vadd.f32 %v565_v49, %v535_v47 }
  0xc8   : > { %v993_v44 = vpop.f32.mrf.mxu2  ;;  %v997_v10 = vpop.f32.mrf.mxu3 }
  0xc9   : > { %v421_v34 = vpop.f32.mrf.mxu0  ;;  %v441_v38 = vpop.f32.mrf.mxu1  ;;  %v551_v49 = vmul.f32 %v993_v44, %v993_v44 }
  0xca   : > { %v536_v51 = vmul.f32 %v421_v34, %v421_v34  ;;  %v495_v54 = vadd.f32 %v494_v50, %v421_v34  ;;  %v544_v18 = vmul.f32 %v441_v38, %v441_v38  ;;  %v892_v34 = vmov 0.0  }
  0xcb   : > { %208 = vst [vmem:[%s1003_s11] sm:$0x1] %v892_v34 }
  0xcc   : > { %v567_v57 = vadd.f32 %v566_v53, %v536_v51  ;;  %209 = vst [vmem:[%s1009_s18] sm:$0x1] %v892_v34 }
  0xd0   : > { %v461_v63 = vpop.f32.mrf.mxu2  ;;  %v481_v28 = vpop.f32.mrf.mxu3 }
  0xd1   : > { %v423_v37 = vpop.f32.mrf.mxu0  ;;  %v443_v52 = vpop.f32.mrf.mxu1 }
  0xd2   : > { %v537_v55 = vmul.f32 %v423_v37, %v423_v37  ;;  %v496_v58 = vadd.f32 %v495_v54, %v423_v37  ;;  %v545_v21 = vmul.f32 %v443_v52, %v443_v52  ;;  %v548_v37 = vmul.f32 %v983_v29, %v983_v29  ;;  %v491_v34 = vld [vmem:[%s1003_s11] sm:$0x1] }
  0xd4   : > { %v568_v60 = vadd.f32 %v567_v57, %v537_v55 }
  0xd8   : > { %v463_v17 = vpop.f32.mrf.mxu2  ;;  %v483_v51 = vpop.f32.mrf.mxu3 }
  0xd9   : > { %v426_v48 = vpop.f32.mrf.mxu0  ;;  %v446_v6 = vpop.f32.mrf.mxu1  ;;  %v553_v57 = vmul.f32 %v463_v17, %v463_v17 }
  0xda   : > { %v538_v59 = vmul.f32 %v426_v48, %v426_v48  ;;  %v497_v61 = vadd.f32 %v496_v58, %v426_v48  ;;  %v546_v26 = vmul.f32 %v446_v6, %v446_v6 }
  0xdc   : > { %v569_v0 = vadd.f32 %v568_v60, %v538_v59 }
  0xe0   : > { %v466_v41 = vpop.f32.mrf.mxu2 }
  0xe1   : > { %v428_v62 = vpop.f32.mrf.mxu0  ;;  %v448_v24 = vpop.f32.mrf.mxu1 }
  0xe2   : > { %v498_v1 = vadd.f32 %v497_v61, %v428_v62  ;;  %v539_v2 = vmul.f32 %v428_v62, %v428_v62  ;;  %v554_v61 = vmul.f32 %v466_v41, %v466_v41 }
  0xe4   : > { %v499_v4 = vadd.f32 %v498_v1, %v431_v25  ;;  %v570_v5 = vadd.f32 %v569_v0, %v539_v2  ;;  %v556_v1 = vmul.f32 %v987_v35, %v987_v35 }
  0xe6   : > { %v500_v8 = vadd.f32 %v499_v4, %v433_v27  ;;  %v571_v9 = vadd.f32 %v570_v5, %v540_v3  ;;  %v486_v3 = vpop.f32.mrf.mxu3 }
  0xe8   : > { %v501_v12 = vadd.f32 %v500_v8, %v436_v30  ;;  %v572_v13 = vadd.f32 %v571_v9, %v541_v7  ;;  %v468_v58 = vpop.f32.mrf.mxu2  ;;  %v559_v9 = vmul.f32 %v997_v10, %v997_v10 }
  0xe9   : > { %v555_v0 = vmul.f32 %v468_v58, %v468_v58 }
  0xea   : > { %v573_v15 = vadd.f32 %v572_v13, %v542_v11  ;;  %v502_v16 = vadd.f32 %v501_v12, %v438_v33  ;;  %v547_v33 = vmul.f32 %v448_v24, %v448_v24  ;;  %v560_v12 = vmul.f32 %v481_v28, %v481_v28 }
  0xec   : > { %v503_v19 = vadd.f32 %v502_v16, %v441_v38  ;;  %v574_v20 = vadd.f32 %v573_v15, %v543_v14  ;;  %v561_v16 = vmul.f32 %v483_v51, %v483_v51 }
  0xee   : > { %v504_v22 = vadd.f32 %v503_v19, %v443_v52  ;;  %v575_v23 = vadd.f32 %v574_v20, %v544_v18  ;;  %v552_v52 = vmul.f32 %v461_v63, %v461_v63  ;;  %v562_v20 = vmul.f32 %v486_v3, %v486_v3 }
  0xf0   : > { %v505_v25 = vadd.f32 %v504_v22, %v446_v6  ;;  %v576_v27 = vadd.f32 %v575_v23, %v545_v21  ;;  %v558_v6 = vmul.f32 %v995_v56, %v995_v56 }
  0xf2   : > { %v577_v30 = vadd.f32 %v576_v27, %v546_v26  ;;  %v506_v31 = vadd.f32 %v505_v25, %v448_v24 }
  0xf4   : > { %v507_v38 = vadd.f32 %v506_v31, %v983_v29  ;;  %v578_v40 = vadd.f32 %v577_v30, %v547_v33 }
  0xf6   : > { %v508_v43 = vadd.f32 %v507_v38, %v985_v32  ;;  %v579_v45 = vadd.f32 %v578_v40, %v548_v37  ;;  %v531_v40 = vld [vmem:[%s1009_s18] sm:$0x1] }
  0xf8   : > { %v509_v47 = vadd.f32 %v508_v43, %v989_v36  ;;  %v580_v48 = vadd.f32 %v579_v45, %v549_v42 }
  0xfa   : > { %v581_v50 = vadd.f32 %v580_v48, %v550_v46  ;;  %v510_v29 = vadd.f32 %v509_v47, %v993_v44 }
  0xfc   : > { %v511_v53 = vadd.f32 %v510_v29, %v461_v63  ;;  %v582_v54 = vadd.f32 %v581_v50, %v551_v49  ;;  %v557_v63 = vmul.f32 %v991_v39, %v991_v39 }
  0xfe   : > { %v512_v55 = vadd.f32 %v511_v53, %v463_v17  ;;  %v583_v32 = vadd.f32 %v582_v54, %v552_v52 }
 0x100   : > { %v584_v59 = vadd.f32 %v583_v32, %v553_v57  ;;  %v513_v60 = vadd.f32 %v512_v55, %v466_v41 }
 0x102   : > { %v585_v62 = vadd.f32 %v584_v59, %v554_v61  ;;  %v514_v36 = vadd.f32 %v513_v60, %v468_v58 }
 0x104   : > { %v515_v2 = vadd.f32 %v514_v36, %v987_v35  ;;  %v586_v44 = vadd.f32 %v585_v62, %v555_v0 }
 0x106   : > { %v516_v4 = vadd.f32 %v515_v2, %v991_v39  ;;  %v587_v5 = vadd.f32 %v586_v44, %v556_v1  ;;  %v488_v39 = vpop.f32.mrf.mxu3 }
 0x107   : > { %v563_v22 = vmul.f32 %v488_v39, %v488_v39 }
 0x108   : > { %v517_v7 = vadd.f32 %v516_v4, %v995_v56  ;;  %v588_v8 = vadd.f32 %v587_v5, %v557_v63 }
 0x10a   : > { %v589_v11 = vadd.f32 %v588_v8, %v558_v6  ;;  %v518_v35 = vadd.f32 %v517_v7, %v997_v10 }
 0x10c   : > { %v519_v13 = vadd.f32 %v518_v35, %v481_v28  ;;  %v590_v14 = vadd.f32 %v589_v11, %v559_v9 }
 0x10e   : > { %v520_v15 = vadd.f32 %v519_v13, %v483_v51  ;;  %v591_v17 = vadd.f32 %v590_v14, %v560_v12 }
 0x110   : > { %v592_v18 = vadd.f32 %v591_v17, %v561_v16  ;;  %v521_v19 = vadd.f32 %v520_v15, %v486_v3 }
 0x112   : > { %v593_v21 = vadd.f32 %v592_v18, %v562_v20  ;;  %v522_v56 = vadd.f32 %v521_v19, %v488_v39 }
 0x114   : > { %v523_v23 = vrot.slane %v522_v56, 4  ;;  %v594_v24 = vadd.f32 %v593_v21, %v563_v22 }
 0x116   : > { %v524_v25 = vadd.f32 %v523_v23, %v522_v56  ;;  %v595_v10 = vrot.slane %v594_v24, 4 }
 0x118   : > { %v525_v26 = vrot.slane %v524_v25, 2  ;;  %v596_v27 = vadd.f32 %v595_v10, %v594_v24 }
 0x11a   : > { %v526_v28 = vadd.f32 %v525_v26, %v524_v25  ;;  %v597_v30 = vrot.slane %v596_v27, 2 }
 0x11c   : > { %v527_v31 = vrot.slane %v526_v28, 1  ;;  %v598_v33 = vadd.f32 %v597_v30, %v596_v27 }
 0x11e   : > { %v528_v37 = vadd.f32 %v527_v31, %v526_v28  ;;  %v599_v38 = vrot.slane %v598_v33, 1 }
 0x120   : > { %v529_v41 = vadd.f32 %v528_v37, %v491_v34  ;;  %v600_v42 = vadd.f32 %v599_v38, %v598_v33 }
 0x122   : > { %530 = vst [vmem:[%s1003_s11] sm:$0x1] %v529_v41  ;;  %v601_v43 = vadd.f32 %v600_v42, %v531_v40 }
 0x124   : > { %602 = vst [vmem:[%s1009_s18] sm:$0x1] %v601_v43 }
 0x125 PF: > { %s14_s14 = sadd.s32 1, %s890_s14   ;;  %s1054_s12 = smov %s886_s13 }
 0x126   : > { %p11_p5 = scmp.ge.s32.totalorder %s14_s14, 4   ;;  %s1055_s13 = smov %s1057_s15 }
 0x128   :  { %13 = sbr.rel (!%p11_p5) target bundleno = 2 (0x2), region = 74 }

// kernel: conv_block_single_pallas.3
= control target key start
LH: loop header
LB: loop body
LE: loop exit
PB: predicated region body
PF: predicated region fallthrough
CT: control target
= control target key end

     0   :  { %s974_s15 = smov 0   ;;  %s976_s16 = smov 0   ;;  %s1197_s0 = inlined_call_operand.vmem [shape: bf16[2,256,128], index: 0, kind: input, shape index: {}]   ;;  %s1198_s1 = inlined_call_operand.vmem [shape: bf16[128,128], index: 1, kind: input, shape index: {}]   ;;  %s1199_s2 = inlined_call_operand.vmem [shape: f32[1,128], index: 2, kind: input, shape index: {}]   ;;  %s1200_s3 = inlined_call_operand.vmem [shape: f32[1,128], index: 3, kind: input, shape index: {}]   ;;  %s1201_s4 = inlined_call_operand.vmem [shape: f32[2,256,8], index: 4, kind: output, shape index: {}]  }
   0x1   :  { %s978_s17 = smov 0  }
   0x2 LB: > { %s26_s18 = sadd.s32 1, %s943_s16  ;;  %p746_p0 = scmp.ge.s32.totalorder %s947_s17, 1  ;;  %s947_s17 = sphi %s978_s17, %s14_s17   ;;  %s943_s16 = sphi %s976_s16, %s1203_s16   ;;  %s939_s15 = sphi %s974_s15, %s1202_s15  }
   0x3   : > { %p28_p1 = scmp.ge.s32.totalorder %s26_s18, 2  ;;  %p183_p2 = scmp.lt.s32.totalorder %s947_s17, 3 }
   0x5   : > { %s1205_s18 = smov (%p28_p1, %s26_s18), 0  ;;  %p184_p3 = pnand %p746_p0, %p183_p2 }
   0x6   : > { %p218_p4 = scmp.lt.s32.totalorder (!%p184_p3), %s939_s15, 1 }
   0x7   : > { %187 = sbr.rel (%p184_p3) target bundleno = 241 (0xf1), region = 36 }
   0xc   : > { %v874_v0 = vld [vmem:[%s1198_s1 + $0x38] sm:$0xff]  ;;  %v873_v1 = vld [vmem:[%s1198_s1 + $0x30] sm:$0xff]  ;;  %v872_v2 = vld [vmem:[%s1198_s1 + $0x28] sm:$0xff]  ;;  %s1207_s15 = smov (!%p218_p4, %s939_s15), 1  ;;  %vm622_vm0 = vcmask 64512  }
   0xd   : > { %429 = vmatpush.bf16.msra.mxu0 %v874_v0  ;;  %875 = vmatpush.bf16.msra.mxu1 %v874_v0  ;;  %v871_v3 = vld [vmem:[%s1198_s1 + $0x20] sm:$0xff]  ;;  %v870_v4 = vld [vmem:[%s1198_s1 + $0x18] sm:$0xff]  ;;  %v869_v5 = vld [vmem:[%s1198_s1 + $0x10] sm:$0xff]  ;;  %s849_s7 = sshll.u32 %s1207_s15, 7  ;;  %s850_s21 = sshll.u32 %s1207_s15, 8 }
   0xe   : > { %876 = vmatpush.bf16.msra.mxu2 %v874_v0  ;;  %877 = vmatpush.bf16.msra.mxu3 %v874_v0  ;;  %v868_v6 = vld [vmem:[%s1198_s1 + $0x8] sm:$0xff]  ;;  %v867_v7 = vld [vmem:[%s1198_s1] sm:$0xff]  ;;  %s1026_s12 = scalar_lea.vmem %s1197_s0, %s849_s7  ;;  %s1062_s24 = scalar_lea.vmem %s1201_s4, %s850_s21 }
   0xf   : > { %v851_v8 = vld [vmem:[%s1026_s12] sm:$0xff]  ;;  %v852_v12 = vld [vmem:[%s1026_s12 + $0x8] sm:$0xff]  ;;  %v853_v16 = vld [vmem:[%s1026_s12 + $0x10] sm:$0xff] }
  0x10   : > { %v855_v9 = vld [vmem:[%s1026_s12 + $0x20] sm:$0xff]  ;;  %v856_v13 = vld [vmem:[%s1026_s12 + $0x28] sm:$0xff]  ;;  %v857_v17 = vld [vmem:[%s1026_s12 + $0x30] sm:$0xff] }
  0x11   : > { %430 = vmatpush.bf16.msra.mxu0 %v873_v1  ;;  %878 = vmatpush.bf16.msra.mxu1 %v873_v1  ;;  %v859_v10 = vld [vmem:[%s1026_s12 + $0x40] sm:$0xff]  ;;  %v860_v14 = vld [vmem:[%s1026_s12 + $0x48] sm:$0xff]  ;;  %v861_v18 = vld [vmem:[%s1026_s12 + $0x50] sm:$0xff] }
  0x12   : > { %879 = vmatpush.bf16.msra.mxu2 %v873_v1  ;;  %880 = vmatpush.bf16.msra.mxu3 %v873_v1  ;;  %v863_v11 = vld [vmem:[%s1026_s12 + $0x60] sm:$0xff]  ;;  %v864_v15 = vld [vmem:[%s1026_s12 + $0x68] sm:$0xff]  ;;  %v865_v19 = vld [vmem:[%s1026_s12 + $0x70] sm:$0xff] }
  0x13   : > { %v854_v20 = vld [vmem:[%s1026_s12 + $0x18] sm:$0xff]  ;;  %v1047_v24 = vld [vmem:[%s1199_s2] ss:$0 sm:$0xff] }
  0x14   : > { %v858_v21 = vld [vmem:[%s1026_s12 + $0x38] sm:$0xff]  ;;  %v1052_v25 = vld [vmem:[%s1200_s3] ss:$0 sm:$0xff] }
  0x15   : > { %431 = vmatpush.bf16.msra.mxu0 %v872_v2  ;;  %881 = vmatpush.bf16.msra.mxu1 %v872_v2  ;;  %v862_v22 = vld [vmem:[%s1026_s12 + $0x58] sm:$0xff] }
  0x16   : > { %882 = vmatpush.bf16.msra.mxu2 %v872_v2  ;;  %883 = vmatpush.bf16.msra.mxu3 %v872_v2  ;;  %v866_v23 = vld [vmem:[%s1026_s12 + $0x78] sm:$0xff] }
  0x19   : > { %432 = vmatpush.bf16.msra.mxu0 %v871_v3  ;;  %884 = vmatpush.bf16.msra.mxu1 %v871_v3 }
  0x1a   : > { %885 = vmatpush.bf16.msra.mxu2 %v871_v3  ;;  %886 = vmatpush.bf16.msra.mxu3 %v871_v3 }
  0x1d   : > { %433 = vmatpush.bf16.msra.mxu0 %v870_v4  ;;  %887 = vmatpush.bf16.msra.mxu1 %v870_v4 }
  0x1e   : > { %888 = vmatpush.bf16.msra.mxu2 %v870_v4  ;;  %889 = vmatpush.bf16.msra.mxu3 %v870_v4 }
  0x21   : > { %434 = vmatpush.bf16.msra.mxu0 %v869_v5  ;;  %890 = vmatpush.bf16.msra.mxu1 %v869_v5 }
  0x22   : > { %891 = vmatpush.bf16.msra.mxu2 %v869_v5  ;;  %892 = vmatpush.bf16.msra.mxu3 %v869_v5 }
  0x25   : > { %435 = vmatpush.bf16.msra.mxu0 %v868_v6  ;;  %893 = vmatpush.bf16.msra.mxu1 %v868_v6 }
  0x26   : > { %894 = vmatpush.bf16.msra.mxu2 %v868_v6  ;;  %895 = vmatpush.bf16.msra.mxu3 %v868_v6 }
  0x29   : > { %436 = vmatpush.bf16.msra.mxu0 %v867_v7  ;;  %896 = vmatpush.bf16.msra.mxu1 %v867_v7 }
  0x2a   : > { %897 = vmatpush.bf16.msra.mxu2 %v867_v7  ;;  %898 = vmatpush.bf16.msra.mxu3 %v867_v7 }
  0x2c   : > { %437 = vmatmul.bf16.vlgmr.msra.gmra.mxu0 %v851_v8  ;;  %457 = vmatmul.bf16.vlgmr.msra.gmra.mxu1 %v855_v9 }
  0x2d   : > { %477 = vmatmul.bf16.vlgmr.msra.gmra.mxu2 %v859_v10  ;;  %497 = vmatmul.bf16.vlgmr.msra.gmra.mxu3 %v863_v11 }
  0x3c   : > { %442 = vmatmul.bf16.gmra.mxu0 %v852_v12  ;;  %462 = vmatmul.bf16.gmra.mxu1 %v856_v13 }
  0x3d   : > { %482 = vmatmul.bf16.gmra.mxu2 %v860_v14  ;;  %502 = vmatmul.bf16.gmra.mxu3 %v864_v15 }
  0x4c   : > { %447 = vmatmul.bf16.gmra.mxu0 %v853_v16  ;;  %467 = vmatmul.bf16.gmra.mxu1 %v857_v17 }
  0x4d   : > { %487 = vmatmul.bf16.gmra.mxu2 %v861_v18  ;;  %507 = vmatmul.bf16.gmra.mxu3 %v865_v19 }
  0x5c   : > { %452 = vmatmul.bf16.gmra.mxu0 %v854_v20  ;;  %472 = vmatmul.bf16.gmra.mxu1 %v858_v21 }
  0x5d   : > { %492 = vmatmul.bf16.gmra.mxu2 %v862_v22  ;;  %512 = vmatmul.bf16.gmra.mxu3 %v866_v23 }
  0xa9   : > { %v438_v26 = vpop.f32.mrf.mxu0  ;;  %v458_v27 = vpop.f32.mrf.mxu1 }
  0xaa   : > { %v522_v28 = vmul.f32 %v1047_v24, %v438_v26  ;;  %v530_v29 = vmul.f32 %v1047_v24, %v458_v27 }
  0xac   : > { %v558_v30 = vadd.f32 %v1052_v25, %v522_v28  ;;  %v566_v31 = vadd.f32 %v1052_v25, %v530_v29 }
  0xae   : > { %v590_v32 = vmax.f32 %v558_v30, 0.0  ;;  %v598_v33 = vmax.f32 %v566_v31, 0.0 }
  0xb0   : > { %623 = vst.msk [vmem:[%s1062_s24] sm:$0xff] %vm622_vm0, %v590_v32  ;;  %v478_v34 = vpop.f32.mrf.mxu2  ;;  %v498_v35 = vpop.f32.mrf.mxu3 }
  0xb1   : > { %631 = vst.msk [vmem:[%s1062_s24 + $0x40] sm:$0xff] %vm622_vm0, %v598_v33  ;;  %v538_v36 = vmul.f32 %v1047_v24, %v478_v34  ;;  %v546_v37 = vmul.f32 %v1047_v24, %v498_v35  ;;  %v440_v38 = vpop.f32.mrf.mxu0  ;;  %v460_v39 = vpop.f32.mrf.mxu1 }
  0xb2   : > { %v523_v40 = vmul.f32 %v1047_v24, %v440_v38  ;;  %v531_v41 = vmul.f32 %v1047_v24, %v460_v39 }
  0xb3   : > { %v574_v42 = vadd.f32 %v1052_v25, %v538_v36  ;;  %v582_v43 = vadd.f32 %v1052_v25, %v546_v37 }
  0xb4   : > { %v559_v44 = vadd.f32 %v1052_v25, %v523_v40  ;;  %v567_v45 = vadd.f32 %v1052_v25, %v531_v41 }
  0xb5   : > { %v606_v46 = vmax.f32 %v574_v42, 0.0  ;;  %v614_v47 = vmax.f32 %v582_v43, 0.0 }
  0xb6   : > { %v591_v48 = vmax.f32 %v559_v44, 0.0  ;;  %v599_v49 = vmax.f32 %v567_v45, 0.0 }
  0xb7   : > { %639 = vst.msk [vmem:[%s1062_s24 + $0x80] sm:$0xff] %vm622_vm0, %v606_v46 }
  0xb8   : > { %647 = vst.msk [vmem:[%s1062_s24 + $0xc0] sm:$0xff] %vm622_vm0, %v614_v47  ;;  %v480_v50 = vpop.f32.mrf.mxu2  ;;  %v500_v51 = vpop.f32.mrf.mxu3 }
  0xb9   : > { %624 = vst.msk [vmem:[%s1062_s24 + $0x8] sm:$0xff] %vm622_vm0, %v591_v48  ;;  %v539_v52 = vmul.f32 %v1047_v24, %v480_v50  ;;  %v547_v53 = vmul.f32 %v1047_v24, %v500_v51  ;;  %v443_v54 = vpop.f32.mrf.mxu0  ;;  %v463_v55 = vpop.f32.mrf.mxu1 }
  0xba   : > { %632 = vst.msk [vmem:[%s1062_s24 + $0x48] sm:$0xff] %vm622_vm0, %v599_v49  ;;  %v524_v56 = vmul.f32 %v1047_v24, %v443_v54  ;;  %v532_v57 = vmul.f32 %v1047_v24, %v463_v55 }
  0xbb   : > { %v575_v58 = vadd.f32 %v1052_v25, %v539_v52  ;;  %v583_v59 = vadd.f32 %v1052_v25, %v547_v53 }
  0xbc   : > { %v560_v60 = vadd.f32 %v1052_v25, %v524_v56  ;;  %v568_v61 = vadd.f32 %v1052_v25, %v532_v57 }
  0xbd   : > { %v607_v62 = vmax.f32 %v575_v58, 0.0  ;;  %v615_v63 = vmax.f32 %v583_v59, 0.0 }
  0xbe   : > { %v592_v0 = vmax.f32 %v560_v60, 0.0  ;;  %v600_v1 = vmax.f32 %v568_v61, 0.0 }
  0xbf   : > { %640 = vst.msk [vmem:[%s1062_s24 + $0x88] sm:$0xff] %vm622_vm0, %v607_v62 }
  0xc0   : > { %648 = vst.msk [vmem:[%s1062_s24 + $0xc8] sm:$0xff] %vm622_vm0, %v615_v63  ;;  %v483_v2 = vpop.f32.mrf.mxu2  ;;  %v503_v3 = vpop.f32.mrf.mxu3 }
  0xc1   : > { %625 = vst.msk [vmem:[%s1062_s24 + $0x10] sm:$0xff] %vm622_vm0, %v592_v0  ;;  %v540_v4 = vmul.f32 %v1047_v24, %v483_v2  ;;  %v548_v5 = vmul.f32 %v1047_v24, %v503_v3  ;;  %v445_v6 = vpop.f32.mrf.mxu0  ;;  %v465_v7 = vpop.f32.mrf.mxu1 }
  0xc2   : > { %633 = vst.msk [vmem:[%s1062_s24 + $0x50] sm:$0xff] %vm622_vm0, %v600_v1  ;;  %v525_v8 = vmul.f32 %v1047_v24, %v445_v6  ;;  %v533_v9 = vmul.f32 %v1047_v24, %v465_v7 }
  0xc3   : > { %v576_v10 = vadd.f32 %v1052_v25, %v540_v4  ;;  %v584_v11 = vadd.f32 %v1052_v25, %v548_v5 }
  0xc4   : > { %v561_v12 = vadd.f32 %v1052_v25, %v525_v8  ;;  %v569_v13 = vadd.f32 %v1052_v25, %v533_v9 }
  0xc5   : > { %v608_v14 = vmax.f32 %v576_v10, 0.0  ;;  %v616_v15 = vmax.f32 %v584_v11, 0.0 }
  0xc6   : > { %v593_v16 = vmax.f32 %v561_v12, 0.0  ;;  %v601_v17 = vmax.f32 %v569_v13, 0.0 }
  0xc7   : > { %641 = vst.msk [vmem:[%s1062_s24 + $0x90] sm:$0xff] %vm622_vm0, %v608_v14 }
  0xc8   : > { %649 = vst.msk [vmem:[%s1062_s24 + $0xd0] sm:$0xff] %vm622_vm0, %v616_v15  ;;  %v485_v18 = vpop.f32.mrf.mxu2  ;;  %v505_v19 = vpop.f32.mrf.mxu3 }
  0xc9   : > { %626 = vst.msk [vmem:[%s1062_s24 + $0x18] sm:$0xff] %vm622_vm0, %v593_v16  ;;  %v541_v20 = vmul.f32 %v1047_v24, %v485_v18  ;;  %v549_v21 = vmul.f32 %v1047_v24, %v505_v19  ;;  %v448_v22 = vpop.f32.mrf.mxu0  ;;  %v468_v23 = vpop.f32.mrf.mxu1 }
  0xca   : > { %634 = vst.msk [vmem:[%s1062_s24 + $0x58] sm:$0xff] %vm622_vm0, %v601_v17  ;;  %v526_v26 = vmul.f32 %v1047_v24, %v448_v22  ;;  %v534_v27 = vmul.f32 %v1047_v24, %v468_v23 }
  0xcb   : > { %v577_v28 = vadd.f32 %v1052_v25, %v541_v20  ;;  %v585_v29 = vadd.f32 %v1052_v25, %v549_v21 }
  0xcc   : > { %v562_v30 = vadd.f32 %v1052_v25, %v526_v26  ;;  %v570_v31 = vadd.f32 %v1052_v25, %v534_v27 }
  0xcd   : > { %v609_v32 = vmax.f32 %v577_v28, 0.0  ;;  %v617_v33 = vmax.f32 %v585_v29, 0.0 }
  0xce   : > { %v594_v34 = vmax.f32 %v562_v30, 0.0  ;;  %v602_v35 = vmax.f32 %v570_v31, 0.0 }
  0xcf   : > { %642 = vst.msk [vmem:[%s1062_s24 + $0x98] sm:$0xff] %vm622_vm0, %v609_v32 }
  0xd0   : > { %650 = vst.msk [vmem:[%s1062_s24 + $0xd8] sm:$0xff] %vm622_vm0, %v617_v33  ;;  %v488_v36 = vpop.f32.mrf.mxu2  ;;  %v508_v37 = vpop.f32.mrf.mxu3 }
  0xd1   : > { %627 = vst.msk [vmem:[%s1062_s24 + $0x20] sm:$0xff] %vm622_vm0, %v594_v34  ;;  %v542_v38 = vmul.f32 %v1047_v24, %v488_v36  ;;  %v550_v39 = vmul.f32 %v1047_v24, %v508_v37  ;;  %v450_v40 = vpop.f32.mrf.mxu0  ;;  %v470_v41 = vpop.f32.mrf.mxu1 }
  0xd2   : > { %635 = vst.msk [vmem:[%s1062_s24 + $0x60] sm:$0xff] %vm622_vm0, %v602_v35  ;;  %v527_v42 = vmul.f32 %v1047_v24, %v450_v40  ;;  %v535_v43 = vmul.f32 %v1047_v24, %v470_v41 }
  0xd3   : > { %v578_v44 = vadd.f32 %v1052_v25, %v542_v38  ;;  %v586_v45 = vadd.f32 %v1052_v25, %v550_v39 }
  0xd4   : > { %v563_v46 = vadd.f32 %v1052_v25, %v527_v42  ;;  %v571_v47 = vadd.f32 %v1052_v25, %v535_v43 }
  0xd5   : > { %v610_v48 = vmax.f32 %v578_v44, 0.0  ;;  %v618_v49 = vmax.f32 %v586_v45, 0.0 }
  0xd6   : > { %v595_v50 = vmax.f32 %v563_v46, 0.0  ;;  %v603_v51 = vmax.f32 %v571_v47, 0.0 }
  0xd7   : > { %643 = vst.msk [vmem:[%s1062_s24 + $0xa0] sm:$0xff] %vm622_vm0, %v610_v48 }
  0xd8   : > { %651 = vst.msk [vmem:[%s1062_s24 + $0xe0] sm:$0xff] %vm622_vm0, %v618_v49  ;;  %v490_v52 = vpop.f32.mrf.mxu2  ;;  %v510_v53 = vpop.f32.mrf.mxu3 }
  0xd9   : > { %628 = vst.msk [vmem:[%s1062_s24 + $0x28] sm:$0xff] %vm622_vm0, %v595_v50  ;;  %v543_v54 = vmul.f32 %v1047_v24, %v490_v52  ;;  %v551_v55 = vmul.f32 %v1047_v24, %v510_v53  ;;  %v453_v56 = vpop.f32.mrf.mxu0  ;;  %v473_v57 = vpop.f32.mrf.mxu1 }
  0xda   : > { %636 = vst.msk [vmem:[%s1062_s24 + $0x68] sm:$0xff] %vm622_vm0, %v603_v51  ;;  %v528_v58 = vmul.f32 %v1047_v24, %v453_v56  ;;  %v536_v59 = vmul.f32 %v1047_v24, %v473_v57 }
  0xdb   : > { %v579_v60 = vadd.f32 %v1052_v25, %v543_v54  ;;  %v587_v61 = vadd.f32 %v1052_v25, %v551_v55 }
  0xdc   : > { %v564_v62 = vadd.f32 %v1052_v25, %v528_v58  ;;  %v572_v63 = vadd.f32 %v1052_v25, %v536_v59 }
  0xdd   : > { %v611_v0 = vmax.f32 %v579_v60, 0.0  ;;  %v619_v1 = vmax.f32 %v587_v61, 0.0 }
  0xde   : > { %v596_v2 = vmax.f32 %v564_v62, 0.0  ;;  %v604_v3 = vmax.f32 %v572_v63, 0.0 }
  0xdf   : > { %644 = vst.msk [vmem:[%s1062_s24 + $0xa8] sm:$0xff] %vm622_vm0, %v611_v0 }
  0xe0   : > { %652 = vst.msk [vmem:[%s1062_s24 + $0xe8] sm:$0xff] %vm622_vm0, %v619_v1  ;;  %v493_v4 = vpop.f32.mrf.mxu2  ;;  %v513_v5 = vpop.f32.mrf.mxu3 }
  0xe1   : > { %629 = vst.msk [vmem:[%s1062_s24 + $0x30] sm:$0xff] %vm622_vm0, %v596_v2  ;;  %v544_v6 = vmul.f32 %v1047_v24, %v493_v4  ;;  %v552_v7 = vmul.f32 %v1047_v24, %v513_v5  ;;  %v455_v8 = vpop.f32.mrf.mxu0  ;;  %v475_v9 = vpop.f32.mrf.mxu1 }
  0xe2   : > { %637 = vst.msk [vmem:[%s1062_s24 + $0x70] sm:$0xff] %vm622_vm0, %v604_v3  ;;  %v529_v10 = vmul.f32 %v1047_v24, %v455_v8  ;;  %v537_v11 = vmul.f32 %v1047_v24, %v475_v9 }
  0xe3   : > { %v580_v12 = vadd.f32 %v1052_v25, %v544_v6  ;;  %v588_v13 = vadd.f32 %v1052_v25, %v552_v7 }
  0xe4   : > { %v565_v14 = vadd.f32 %v1052_v25, %v529_v10  ;;  %v573_v15 = vadd.f32 %v1052_v25, %v537_v11 }
  0xe5   : > { %v612_v16 = vmax.f32 %v580_v12, 0.0  ;;  %v620_v17 = vmax.f32 %v588_v13, 0.0 }
  0xe6   : > { %v597_v18 = vmax.f32 %v565_v14, 0.0  ;;  %v605_v19 = vmax.f32 %v573_v15, 0.0 }
  0xe7   : > { %645 = vst.msk [vmem:[%s1062_s24 + $0xb0] sm:$0xff] %vm622_vm0, %v612_v16 }
  0xe8   : > { %653 = vst.msk [vmem:[%s1062_s24 + $0xf0] sm:$0xff] %vm622_vm0, %v620_v17  ;;  %v495_v20 = vpop.f32.mrf.mxu2  ;;  %v515_v21 = vpop.f32.mrf.mxu3 }
  0xe9   : > { %630 = vst.msk [vmem:[%s1062_s24 + $0x38] sm:$0xff] %vm622_vm0, %v597_v18  ;;  %v545_v22 = vmul.f32 %v1047_v24, %v495_v20  ;;  %v553_v23 = vmul.f32 %v1047_v24, %v515_v21 }
  0xea   : > { %638 = vst.msk [vmem:[%s1062_s24 + $0x78] sm:$0xff] %vm622_vm0, %v605_v19 }
  0xeb   : > { %v581_v26 = vadd.f32 %v1052_v25, %v545_v22  ;;  %v589_v27 = vadd.f32 %v1052_v25, %v553_v23 }
  0xed   : > { %v613_v28 = vmax.f32 %v581_v26, 0.0  ;;  %v621_v29 = vmax.f32 %v589_v27, 0.0 }
  0xef   : > { %646 = vst.msk [vmem:[%s1062_s24 + $0xb8] sm:$0xff] %vm622_vm0, %v613_v28 }
  0xf0   : > { %654 = vst.msk [vmem:[%s1062_s24 + $0xf8] sm:$0xff] %vm622_vm0, %v621_v29 }
  0xf1 PF: > { %s14_s17 = sadd.s32 1, %s947_s17   ;;  %s1202_s15 = smov %s943_s16 }
  0xf2   : > { %p11_p5 = scmp.ge.s32.totalorder %s14_s17, 4   ;;  %s1203_s16 = smov %s1205_s18 }
  0xf4   :  { %13 = sbr.rel (!%p11_p5) target bundleno = 2 (0x2), region = 66 }

</bundles_post_ra>
